<compile_context>
chip_gen: v5e
topology: v5e:2x2
jax: 0.10.0
libtpu: 0.0.40
codegen_flags: <defaults>
</compile_context>

<pallas_src>
import functools

import jax
import jax.numpy as jnp
from jax import lax
from jax.experimental import pallas as pl
from jax.experimental.pallas import tpu as pltpu

_NEG_INF = -1e20  # matches torch masked_fill value


def _mha_kernel(q_ref, k_ref, v_ref, mask_ref,
                wq_ref, bq_ref, wk_ref, bk_ref, wv_ref, bv_ref,
                wo_ref, bo_ref, out_ref, pv_ref, *,
                num_heads, dim_q, dim_k, batch_tile, neg_bias):
    """One grid step processes `batch_tile` batch rows.

    Matmuls run on the MXU with bf16 operands / f32 accumulation; the softmax
    (mask bias, max, exp, sum, normalize) stays in f32 on the VPU/EUP (safe on
    v5e, which has no bf16 VPU/EUP).
    """
    Bt = batch_tile
    Sq = q_ref.shape[1]
    Sk = k_ref.shape[1]
    dim_in = q_ref.shape[2]

    # ---- head-fused Q/K/V projections --------------------------------------
    # Weights arrive pre-transposed & head-fused; 1/sqrt(dim_q) is already
    # folded into wq/bq, so no per-head scale multiply is needed below.
    xq = q_ref[...].reshape(Bt * Sq, dim_in)          # bf16 (cast in wrapper)
    xk = k_ref[...].reshape(Bt * Sk, dim_in)
    xv = v_ref[...].reshape(Bt * Sk, dim_in)

    q_all = (jnp.dot(xq, wq_ref[...], preferred_element_type=jnp.float32)
             + bq_ref[...]).astype(jnp.bfloat16)      # (Bt*Sq, H*dq), scaled
    k_all = (jnp.dot(xk, wk_ref[...], preferred_element_type=jnp.float32)
             + bk_ref[...]).astype(jnp.bfloat16)      # (Bt*Sk, H*dk)
    v_all = (jnp.dot(xv, wv_ref[...], preferred_element_type=jnp.float32)
             + bv_ref[...]).astype(jnp.bfloat16)      # (Bt*Sk, H*dk)

    wo = wo_ref[...]          # (H*dk, Din), bf16, pre-transposed
    bo = bo_ref[...]          # (1, Din), f32

    for b in range(Bt):                                # static; bt kept small
        # Compact int8 mask -> additive f32 bias (bias value already carries
        # the 1/sqrt(dim_q) factor). Built once per batch row, reused per head.
        mask_b = mask_ref[b].astype(jnp.float32)       # (Sq, Sk)
        bias_b = jnp.where(mask_b == 0.0,
                           jnp.float32(neg_bias), jnp.float32(0.0))

        # TODO(synk): for production Sk, tile the KV axis with a flash-style
        #   online softmax (running max / denom) instead of materializing the
        #   full (Sq, Sk) scores tile.
        # TODO(synk): for production num_heads, switch to a head-major
        #   (H, Sq, d) layout driven by a single batched dot_general (or a
        #   lax.fori_loop over heads) instead of static 16-lane slices, to
        #   avoid per-head lane relayouts and unbounded live ranges.
        for h in range(num_heads):                     # static, small H
            qh = q_all[b * Sq:(b + 1) * Sq, h * dim_q:(h + 1) * dim_q]  # (Sq, dq)
            kh = k_all[b * Sk:(b + 1) * Sk, h * dim_k:(h + 1) * dim_k]  # (Sk, dk)
            vh = v_all[b * Sk:(b + 1) * Sk, h * dim_k:(h + 1) * dim_k]  # (Sk, dk)

            # Q @ K^T via transposed contraction (no materialized kh.T).
            scores = lax.dot_general(
                qh, kh, dimension_numbers=(((1,), (1,)), ((), ())),
                preferred_element_type=jnp.float32)                     # (Sq, Sk)

            # Scale already folded into Q; just add the masked bias (f32).
            logits = scores + bias_b
            logits = logits - jnp.max(logits, axis=-1, keepdims=True)
            p = jnp.exp(logits)
            denom = jnp.sum(p, axis=-1, keepdims=True)
            p = p * pl.reciprocal(denom, approx=True)   # EUP, frees VALU slots

            # Per-head P@V is parked lane-contiguously in VMEM scratch; the
            # output projection is done once, fused over all heads, below.
            pv = jnp.dot(p.astype(jnp.bfloat16), vh,
                         preferred_element_type=jnp.float32)            # (Sq, dk)
            pv_ref[:, h * dim_k:(h + 1) * dim_k] = pv.astype(jnp.bfloat16)

        # Single fused output projection: (Sq, H*dk) @ (H*dk, Din).
        out_b = jnp.dot(pv_ref[...], wo, preferred_element_type=jnp.float32) + bo
        # NOTE: with dim_in=32 this is a masked partial store; at production
        # sizes pick dim_in as a multiple of 128 for a lane-dense vst (v5e has
        # a single vector-store slot and is hit hardest by vst.msk).
        out_ref[b] = out_b.astype(out_ref.dtype)


def _mxu_m_target():
    """Per-generation MXU M-row target: 128 on v5e (4x128^2), 256 on v6e/v7x."""
    try:
        info = pltpu.get_tpu_info()
        ver = str(getattr(info, "chip_version", "")).lower()
        return 128 if "v5" in ver else 256
    except Exception:
        return 256


def _pick_batch_tile(B, Sq, target_rows=256):
    """Stack batch rows onto the MXU M dim; keep >=2 'parallel' grid steps when
    possible (v7x has 2 TensorCores per chip)."""
    best = 1
    for bt in range(1, B + 1):
        if B % bt:
            continue
        if B >= 2 and B // bt < 2:
            continue
        if bt * Sq <= max(target_rows, Sq):
            best = bt
    return best


def _vmem_limit_bytes(bt, Sq, Sk, dim_in, num_heads, dim_q, dim_k):
    """Rough per-step VMEM budget (double-buffered streams + resident weights +
    intermediates), with generous headroom; clamped to <=32 MiB which is safe
    on v5e/v6e and inside the v7x 64 MiB (32 MiB scoped default) budget."""
    bf16, f32 = 2, 4
    hq, hk = num_heads * dim_q, num_heads * dim_k
    stream = 2 * bt * (Sq * dim_in * bf16 + 2 * Sk * dim_in * bf16 + Sq * Sk * 1)
    outbuf = 2 * bt * Sq * dim_in * f32
    weights = (dim_in * hq + 2 * dim_in * hk + hk * dim_in) * bf16 \
        + (hq + 2 * hk + dim_in) * f32
    interm = bt * (Sq * hq + 2 * Sk * hk) * (f32 + bf16) \
        + 3 * Sq * Sk * f32 + Sq * hk * bf16 + Sq * dim_in * f32
    est = stream + outbuf + weights + interm
    return int(min(32 << 20, max(16 << 20, 4 * est)))


def multi_head_attention(query, key, value, mask, params, *,
                         num_heads, dim_q, dim_k, batch_tile=None):
    B, Sq, dim_in = query.shape
    Sk = key.shape[1]
    assert dim_q == dim_k, "Q @ K^T requires dim_q == dim_k"
    wq, bq, wk, bk, wv, bv, wo, bo = params   # torch-convention weights

    f32, bf16 = jnp.float32, jnp.bfloat16
    inv_scale = 1.0 / (float(dim_q) ** 0.5)

    # ---- wrapper-side weight plumbing (free, runs once) ---------------------
    # Fold 1/sqrt(dim_q) into the Q projection; fuse heads; pre-transpose.
    wq_all = (wq.reshape(num_heads * dim_q, dim_in).T * inv_scale).astype(bf16)
    bq_all = (bq.reshape(1, num_heads * dim_q) * inv_scale).astype(f32)
    wk_all = wk.reshape(num_heads * dim_k, dim_in).T.astype(bf16)
    bk_all = bk.reshape(1, num_heads * dim_k).astype(f32)
    wv_all = wv.reshape(num_heads * dim_k, dim_in).T.astype(bf16)
    bv_all = bv.reshape(1, num_heads * dim_k).astype(f32)
    wo_t = wo.T.astype(bf16)                                        # (H*dk, Din)
    bo2 = bo.reshape(1, dim_in).astype(f32)

    # bf16 activations: half the HBM traffic / VMEM tiles for q, k, v.
    q_b = query.astype(bf16)
    k_b = key.astype(bf16)
    v_b = value.astype(bf16)

    # Compact 1-byte mask; the additive -1e20/sqrt(dq) bias is built in-kernel.
    mask_i8 = (jnp.broadcast_to(mask, (B, Sq, Sk)) != 0).astype(jnp.int8)

    bt = (_pick_batch_tile(B, Sq, target_rows=_mxu_m_target())
          if batch_tile is None else batch_tile)
    assert B % bt == 0

    neg_bias = float(_NEG_INF) * inv_scale   # exact same masked logit as torch
    kernel = functools.partial(_mha_kernel, num_heads=num_heads, dim_q=dim_q,
                               dim_k=dim_k, batch_tile=bt, neg_bias=neg_bias)

    def batched(shape):
        nd = len(shape)
        return pl.BlockSpec((bt,) + shape, lambda b, _n=nd: (b,) + (0,) * _n)

    def resident(shape):   # grid-invariant weights / biases
        nd = len(shape)
        return pl.BlockSpec(shape, lambda b, _n=nd: (0,) * _n)

    return pl.pallas_call(
        kernel,
        out_shape=jax.ShapeDtypeStruct((B, Sq, dim_in), jnp.float32),
        grid_spec=pltpu.PrefetchScalarGridSpec(
            num_scalar_prefetch=0,
            grid=(B // bt,),
            in_specs=[
                batched((Sq, dim_in)),                    # query (bf16)
                batched((Sk, dim_in)),                    # key (bf16)
                batched((Sk, dim_in)),                    # value (bf16)
                batched((Sq, Sk)),                        # compact mask (int8)
                resident((dim_in, num_heads * dim_q)),    # Wq * inv_scale
                resident((1, num_heads * dim_q)),         # bq * inv_scale
                resident((dim_in, num_heads * dim_k)),    # Wk
                resident((1, num_heads * dim_k)),         # bk
                resident((dim_in, num_heads * dim_k)),    # Wv
                resident((1, num_heads * dim_k)),         # bv
                resident((num_heads * dim_k, dim_in)),    # Wo^T (fused out-proj)
                resident((1, dim_in)),                    # bo
            ],
            out_specs=batched((Sq, dim_in)),
            scratch_shapes=[pltpu.VMEM((Sq, num_heads * dim_k), jnp.bfloat16)],
        ),
        compiler_params=pltpu.CompilerParams(
            dimension_semantics=("parallel",),
            vmem_limit_bytes=_vmem_limit_bytes(bt, Sq, Sk, dim_in,
                                               num_heads, dim_q, dim_k)),
    )(q_b, k_b, v_b, mask_i8,
      wq_all, bq_all, wk_all, bk_all, wv_all, bv_all, wo_t, bo2)


def reference_mha(query, key, value, mask, params, *, num_heads, dim_q, dim_k):
    """Pure-JAX replica of the PyTorch forward for verification."""
    wq, bq, wk, bk, wv, bv, wo, bo = params
    scale = float(dim_q) ** 0.5
    outs = []
    for h in range(num_heads):
        q = query @ wq[h].T + bq[h]
        k = key @ wk[h].T + bk[h]
        v = value @ wv[h].T + bv[h]
        s = jnp.einsum('bqd,bkd->bqk', q, k)
        s = jnp.where(mask == 0, _NEG_INF, s) / scale
        p = jax.nn.softmax(s, axis=-1)
        outs.append(jnp.einsum('bqk,bkd->bqd', p, v))
    cat = jnp.concatenate(outs, axis=-1)
    return cat @ wo.T + bo[0]


if __name__ == "__main__":
    # Small, module-consistent shapes.
    B, Sq, Sk = 2, 8, 8
    dim_in, dim_q, dim_k, num_heads = 32, 16, 16, 4

    key0 = jax.random.PRNGKey(0)
    ks = jax.random.split(key0, 12)

    query = jax.random.normal(ks[0], (B, Sq, dim_in), jnp.float32)
    key_t = jax.random.normal(ks[1], (B, Sk, dim_in), jnp.float32)
    value = jax.random.normal(ks[2], (B, Sk, dim_in), jnp.float32)
    mask = (jax.random.uniform(ks[3], (B, Sq, Sk)) > 0.2).astype(jnp.float32)
    # Guarantee at least one unmasked entry per row (diagonal).
    mask = jnp.maximum(mask, jnp.eye(Sq, Sk)[None, :, :])

    init = lambda k, shape: 0.1 * jax.random.normal(k, shape, jnp.float32)
    params = (
        init(ks[4], (num_heads, dim_q, dim_in)),   # Wq (torch layout: out, in)
        init(ks[5], (num_heads, dim_q)),           # bq
        init(ks[6], (num_heads, dim_k, dim_in)),   # Wk
        init(ks[7], (num_heads, dim_k)),           # bk
        init(ks[8], (num_heads, dim_k, dim_in)),   # Wv
        init(ks[9], (num_heads, dim_k)),           # bv
        init(ks[10], (dim_in, num_heads * dim_k)), # Wo
        init(ks[11], (1, dim_in)),                 # bo
    )

    out = multi_head_attention(query, key_t, value, mask, params,
                               num_heads=num_heads, dim_q=dim_q, dim_k=dim_k)
    out = jax.block_until_ready(out)

    ref = reference_mha(query, key_t, value, mask, params,
                        num_heads=num_heads, dim_q=dim_q, dim_k=dim_k)

    assert out.shape == (B, Sq, dim_in)
    # bf16 MXU operands / bf16 activations (f32 accumulation) + approx
    # reciprocal -> slightly looser tolerance than a pure-f32 kernel.
    max_err = float(jnp.max(jnp.abs(out - ref)))
    assert jnp.allclose(out, ref, atol=5e-2, rtol=5e-2), (
        f"mismatch vs reference: max abs err {max_err}")
    print("KERNEL_OK")
</pallas_src>

<mosaic_0001>
module attributes {stable_mosaic.version = 11 : i64} {
  func.func @_mha_kernel(%arg0: i32, %arg1: memref<1x8x32xbf16, #tpu.memory_space<vmem>>, %arg2: memref<1x8x32xbf16, #tpu.memory_space<vmem>>, %arg3: memref<1x8x32xbf16, #tpu.memory_space<vmem>>, %arg4: memref<1x8x8xi8, #tpu.memory_space<vmem>>, %arg5: memref<32x64xbf16, #tpu.memory_space<vmem>>, %arg6: memref<1x64xf32, #tpu.memory_space<vmem>>, %arg7: memref<32x64xbf16, #tpu.memory_space<vmem>>, %arg8: memref<1x64xf32, #tpu.memory_space<vmem>>, %arg9: memref<32x64xbf16, #tpu.memory_space<vmem>>, %arg10: memref<1x64xf32, #tpu.memory_space<vmem>>, %arg11: memref<64x32xbf16, #tpu.memory_space<vmem>>, %arg12: memref<1x32xf32, #tpu.memory_space<vmem>>, %arg13: memref<1x8x32xf32, #tpu.memory_space<vmem>>, %arg14: memref<8x64xbf16, #tpu.memory_space<vmem>>) attributes {dimension_semantics = [#tpu.dimension_semantics<parallel>], iteration_bounds = array<i64: 2>, scalar_prefetch = 0 : i64, scratch_operands = 1 : i64, tpu.core_type = #tpu.core_type<tc>, window_params = [{transform_indices = @transform_0, window_bounds = array<i64: 1, 8, 32>}, {transform_indices = @transform_1, window_bounds = array<i64: 1, 8, 32>}, {transform_indices = @transform_2, window_bounds = array<i64: 1, 8, 32>}, {transform_indices = @transform_3, window_bounds = array<i64: 1, 8, 8>}, {pipeline_mode = #tpu.pipeline_mode<synchronous>, transform_indices = @transform_4, window_bounds = array<i64: 32, 64>}, {pipeline_mode = #tpu.pipeline_mode<synchronous>, transform_indices = @transform_5, window_bounds = array<i64: 1, 64>}, {pipeline_mode = #tpu.pipeline_mode<synchronous>, transform_indices = @transform_6, window_bounds = array<i64: 32, 64>}, {pipeline_mode = #tpu.pipeline_mode<synchronous>, transform_indices = @transform_7, window_bounds = array<i64: 1, 64>}, {pipeline_mode = #tpu.pipeline_mode<synchronous>, transform_indices = @transform_8, window_bounds = array<i64: 32, 64>}, {pipeline_mode = #tpu.pipeline_mode<synchronous>, transform_indices = @transform_9, window_bounds = array<i64: 1, 64>}, {pipeline_mode = #tpu.pipeline_mode<synchronous>, transform_indices = @transform_10, window_bounds = array<i64: 64, 32>}, {pipeline_mode = #tpu.pipeline_mode<synchronous>, transform_indices = @transform_11, window_bounds = array<i64: 1, 32>}, {transform_indices = @transform_12, window_bounds = array<i64: 1, 8, 32>}]} {
    %c0 = arith.constant 0 : index
    %c0_0 = arith.constant 0 : index
    %c0_1 = arith.constant 0 : index
    %0 = vector.load %arg1[%c0, %c0_0, %c0_1] : memref<1x8x32xbf16, #tpu.memory_space<vmem>>, vector<1x8x32xbf16>
    %1 = vector.shape_cast %0 : vector<1x8x32xbf16> to vector<8x32xbf16>
    %c0_2 = arith.constant 0 : index
    %c0_3 = arith.constant 0 : index
    %c0_4 = arith.constant 0 : index
    %2 = vector.load %arg2[%c0_2, %c0_3, %c0_4] : memref<1x8x32xbf16, #tpu.memory_space<vmem>>, vector<1x8x32xbf16>
    %3 = vector.shape_cast %2 : vector<1x8x32xbf16> to vector<8x32xbf16>
    %c0_5 = arith.constant 0 : index
    %c0_6 = arith.constant 0 : index
    %c0_7 = arith.constant 0 : index
    %4 = vector.load %arg3[%c0_5, %c0_6, %c0_7] : memref<1x8x32xbf16, #tpu.memory_space<vmem>>, vector<1x8x32xbf16>
    %5 = vector.shape_cast %4 : vector<1x8x32xbf16> to vector<8x32xbf16>
    %c0_8 = arith.constant 0 : index
    %c0_9 = arith.constant 0 : index
    %6 = vector.load %arg5[%c0_8, %c0_9] : memref<32x64xbf16, #tpu.memory_space<vmem>>, vector<32x64xbf16>
    %cst = arith.constant dense<0.000000e+00> : vector<8x64xf32>
    %7 = tpu.matmul %1, %6, %cst {dimension_numbers = #tpu.dot_dimension_numbers<[1], [0], [0], [1], [0, 0, 1, 1], [], []>} : vector<8x32xbf16>, vector<32x64xbf16>, vector<8x64xf32> -> vector<8x64xf32>
    %c0_10 = arith.constant 0 : index
    %c0_11 = arith.constant 0 : index
    %8 = vector.load %arg6[%c0_10, %c0_11] : memref<1x64xf32, #tpu.memory_space<vmem>>, vector<1x64xf32>
    %9 = vector.broadcast %8 : vector<1x64xf32> to vector<8x64xf32>
    %10 = arith.addf %7, %9 : vector<8x64xf32>
    %11 = arith.truncf %10 : vector<8x64xf32> to vector<8x64xbf16>
    %c0_12 = arith.constant 0 : index
    %c0_13 = arith.constant 0 : index
    %12 = vector.load %arg7[%c0_12, %c0_13] : memref<32x64xbf16, #tpu.memory_space<vmem>>, vector<32x64xbf16>
    %cst_14 = arith.constant dense<0.000000e+00> : vector<8x64xf32>
    %13 = tpu.matmul %3, %12, %cst_14 {dimension_numbers = #tpu.dot_dimension_numbers<[1], [0], [0], [1], [0, 0, 1, 1], [], []>} : vector<8x32xbf16>, vector<32x64xbf16>, vector<8x64xf32> -> vector<8x64xf32>
    %c0_15 = arith.constant 0 : index
    %c0_16 = arith.constant 0 : index
    %14 = vector.load %arg8[%c0_15, %c0_16] : memref<1x64xf32, #tpu.memory_space<vmem>>, vector<1x64xf32>
    %15 = vector.broadcast %14 : vector<1x64xf32> to vector<8x64xf32>
    %16 = arith.addf %13, %15 : vector<8x64xf32>
    %17 = arith.truncf %16 : vector<8x64xf32> to vector<8x64xbf16>
    %c0_17 = arith.constant 0 : index
    %c0_18 = arith.constant 0 : index
    %18 = vector.load %arg9[%c0_17, %c0_18] : memref<32x64xbf16, #tpu.memory_space<vmem>>, vector<32x64xbf16>
    %cst_19 = arith.constant dense<0.000000e+00> : vector<8x64xf32>
    %19 = tpu.matmul %5, %18, %cst_19 {dimension_numbers = #tpu.dot_dimension_numbers<[1], [0], [0], [1], [0, 0, 1, 1], [], []>} : vector<8x32xbf16>, vector<32x64xbf16>, vector<8x64xf32> -> vector<8x64xf32>
    %c0_20 = arith.constant 0 : index
    %c0_21 = arith.constant 0 : index
    %20 = vector.load %arg10[%c0_20, %c0_21] : memref<1x64xf32, #tpu.memory_space<vmem>>, vector<1x64xf32>
    %21 = vector.broadcast %20 : vector<1x64xf32> to vector<8x64xf32>
    %22 = arith.addf %19, %21 : vector<8x64xf32>
    %23 = arith.truncf %22 : vector<8x64xf32> to vector<8x64xbf16>
    %c0_22 = arith.constant 0 : index
    %c0_23 = arith.constant 0 : index
    %24 = vector.load %arg11[%c0_22, %c0_23] : memref<64x32xbf16, #tpu.memory_space<vmem>>, vector<64x32xbf16>
    %c0_24 = arith.constant 0 : index
    %c0_25 = arith.constant 0 : index
    %25 = vector.load %arg12[%c0_24, %c0_25] : memref<1x32xf32, #tpu.memory_space<vmem>>, vector<1x32xf32>
    %c0_26 = arith.constant 0 : index
    %c0_27 = arith.constant 0 : index
    %c0_28 = arith.constant 0 : index
    %26 = vector.load %arg4[%c0_26, %c0_27, %c0_28] : memref<1x8x8xi8, #tpu.memory_space<vmem>>, vector<1x8x8xi8>
    %27 = vector.shape_cast %26 : vector<1x8x8xi8> to vector<8x8xi8>
    %28 = arith.sitofp %27 : vector<8x8xi8> to vector<8x8xf32>
    %cst_29 = arith.constant 0.000000e+00 : f32
    %29 = vector.broadcast %cst_29 : f32 to vector<8x8xf32>
    %30 = arith.cmpf oeq, %28, %29 : vector<8x8xf32>
    %cst_30 = arith.constant -2.500000e+19 : f32
    %cst_31 = arith.constant 0.000000e+00 : f32
    %31 = vector.broadcast %cst_30 : f32 to vector<8x8xf32>
    %32 = vector.broadcast %cst_31 : f32 to vector<8x8xf32>
    %33 = arith.select %30, %31, %32 : vector<8x8xi1>, vector<8x8xf32>
    %34 = vector.extract_strided_slice %11 {offsets = [0, 0], sizes = [8, 16], strides = [1, 1]} : vector<8x64xbf16> to vector<8x16xbf16>
    %35 = vector.extract_strided_slice %17 {offsets = [0, 0], sizes = [8, 16], strides = [1, 1]} : vector<8x64xbf16> to vector<8x16xbf16>
    %36 = vector.extract_strided_slice %23 {offsets = [0, 0], sizes = [8, 16], strides = [1, 1]} : vector<8x64xbf16> to vector<8x16xbf16>
    %cst_32 = arith.constant dense<0.000000e+00> : vector<8x8xf32>
    %37 = tpu.matmul %34, %35, %cst_32 {dimension_numbers = #tpu.dot_dimension_numbers<[1], [1], [0], [0], [0, 0, 1, 0], [], []>} : vector<8x16xbf16>, vector<8x16xbf16>, vector<8x8xf32> -> vector<8x8xf32>
    %38 = arith.addf %37, %33 : vector<8x8xf32>
    %cst_33 = arith.constant dense<0xFF800000> : vector<8xf32>
    %39 = vector.multi_reduction <maximumf>, %38, %cst_33 [1] : vector<8x8xf32> to vector<8xf32>
    %40 = vector.shape_cast %39 : vector<8xf32> to vector<8x1xf32>
    %41 = vector.broadcast %40 : vector<8x1xf32> to vector<8x8xf32>
    %42 = arith.subf %38, %41 : vector<8x8xf32>
    %43 = math.exp %42 : vector<8x8xf32>
    %cst_34 = arith.constant dense<0.000000e+00> : vector<8xf32>
    %44 = vector.multi_reduction <add>, %43, %cst_34 [1] : vector<8x8xf32> to vector<8xf32>
    %45 = vector.shape_cast %44 : vector<8xf32> to vector<8x1xf32>
    %46 = tpu.reciprocal %45 {approx = true} : vector<8x1xf32> -> vector<8x1xf32>
    %47 = vector.broadcast %46 : vector<8x1xf32> to vector<8x8xf32>
    %48 = arith.mulf %43, %47 : vector<8x8xf32>
    %49 = arith.truncf %48 : vector<8x8xf32> to vector<8x8xbf16>
    %cst_35 = arith.constant dense<0.000000e+00> : vector<8x16xf32>
    %50 = tpu.matmul %49, %36, %cst_35 {dimension_numbers = #tpu.dot_dimension_numbers<[1], [0], [0], [1], [0, 0, 1, 1], [], []>} : vector<8x8xbf16>, vector<8x16xbf16>, vector<8x16xf32> -> vector<8x16xf32>
    %51 = arith.truncf %50 : vector<8x16xf32> to vector<8x16xbf16>
    %c0_36 = arith.constant 0 : index
    %c0_37 = arith.constant 0 : index
    %52 = vector.load %arg14[%c0_36, %c0_37] : memref<8x64xbf16, #tpu.memory_space<vmem>>, vector<8x16xbf16>
    tpu.vector_store %arg14[%c0_36, %c0_37], %51 {strides = array<i32>} : memref<8x64xbf16, #tpu.memory_space<vmem>>, vector<8x16xbf16>,
    %53 = vector.extract_strided_slice %11 {offsets = [0, 16], sizes = [8, 16], strides = [1, 1]} : vector<8x64xbf16> to vector<8x16xbf16>
    %54 = vector.extract_strided_slice %17 {offsets = [0, 16], sizes = [8, 16], strides = [1, 1]} : vector<8x64xbf16> to vector<8x16xbf16>
    %55 = vector.extract_strided_slice %23 {offsets = [0, 16], sizes = [8, 16], strides = [1, 1]} : vector<8x64xbf16> to vector<8x16xbf16>
    %cst_38 = arith.constant dense<0.000000e+00> : vector<8x8xf32>
    %56 = tpu.matmul %53, %54, %cst_38 {dimension_numbers = #tpu.dot_dimension_numbers<[1], [1], [0], [0], [0, 0, 1, 0], [], []>} : vector<8x16xbf16>, vector<8x16xbf16>, vector<8x8xf32> -> vector<8x8xf32>
    %57 = arith.addf %56, %33 : vector<8x8xf32>
    %cst_39 = arith.constant dense<0xFF800000> : vector<8xf32>
    %58 = vector.multi_reduction <maximumf>, %57, %cst_39 [1] : vector<8x8xf32> to vector<8xf32>
    %59 = vector.shape_cast %58 : vector<8xf32> to vector<8x1xf32>
    %60 = vector.broadcast %59 : vector<8x1xf32> to vector<8x8xf32>
    %61 = arith.subf %57, %60 : vector<8x8xf32>
    %62 = math.exp %61 : vector<8x8xf32>
    %cst_40 = arith.constant dense<0.000000e+00> : vector<8xf32>
    %63 = vector.multi_reduction <add>, %62, %cst_40 [1] : vector<8x8xf32> to vector<8xf32>
    %64 = vector.shape_cast %63 : vector<8xf32> to vector<8x1xf32>
    %65 = tpu.reciprocal %64 {approx = true} : vector<8x1xf32> -> vector<8x1xf32>
    %66 = vector.broadcast %65 : vector<8x1xf32> to vector<8x8xf32>
    %67 = arith.mulf %62, %66 : vector<8x8xf32>
    %68 = arith.truncf %67 : vector<8x8xf32> to vector<8x8xbf16>
    %cst_41 = arith.constant dense<0.000000e+00> : vector<8x16xf32>
    %69 = tpu.matmul %68, %55, %cst_41 {dimension_numbers = #tpu.dot_dimension_numbers<[1], [0], [0], [1], [0, 0, 1, 1], [], []>} : vector<8x8xbf16>, vector<8x16xbf16>, vector<8x16xf32> -> vector<8x16xf32>
    %70 = arith.truncf %69 : vector<8x16xf32> to vector<8x16xbf16>
    %c0_42 = arith.constant 0 : index
    %c16 = arith.constant 16 : index
    %71 = vector.load %arg14[%c0_42, %c16] : memref<8x64xbf16, #tpu.memory_space<vmem>>, vector<8x16xbf16>
    tpu.vector_store %arg14[%c0_42, %c16], %70 {strides = array<i32>} : memref<8x64xbf16, #tpu.memory_space<vmem>>, vector<8x16xbf16>,
    %72 = vector.extract_strided_slice %11 {offsets = [0, 32], sizes = [8, 16], strides = [1, 1]} : vector<8x64xbf16> to vector<8x16xbf16>
    %73 = vector.extract_strided_slice %17 {offsets = [0, 32], sizes = [8, 16], strides = [1, 1]} : vector<8x64xbf16> to vector<8x16xbf16>
    %74 = vector.extract_strided_slice %23 {offsets = [0, 32], sizes = [8, 16], strides = [1, 1]} : vector<8x64xbf16> to vector<8x16xbf16>
    %cst_43 = arith.constant dense<0.000000e+00> : vector<8x8xf32>
    %75 = tpu.matmul %72, %73, %cst_43 {dimension_numbers = #tpu.dot_dimension_numbers<[1], [1], [0], [0], [0, 0, 1, 0], [], []>} : vector<8x16xbf16>, vector<8x16xbf16>, vector<8x8xf32> -> vector<8x8xf32>
    %76 = arith.addf %75, %33 : vector<8x8xf32>
    %cst_44 = arith.constant dense<0xFF800000> : vector<8xf32>
    %77 = vector.multi_reduction <maximumf>, %76, %cst_44 [1] : vector<8x8xf32> to vector<8xf32>
    %78 = vector.shape_cast %77 : vector<8xf32> to vector<8x1xf32>
    %79 = vector.broadcast %78 : vector<8x1xf32> to vector<8x8xf32>
    %80 = arith.subf %76, %79 : vector<8x8xf32>
    %81 = math.exp %80 : vector<8x8xf32>
    %cst_45 = arith.constant dense<0.000000e+00> : vector<8xf32>
    %82 = vector.multi_reduction <add>, %81, %cst_45 [1] : vector<8x8xf32> to vector<8xf32>
    %83 = vector.shape_cast %82 : vector<8xf32> to vector<8x1xf32>
    %84 = tpu.reciprocal %83 {approx = true} : vector<8x1xf32> -> vector<8x1xf32>
    %85 = vector.broadcast %84 : vector<8x1xf32> to vector<8x8xf32>
    %86 = arith.mulf %81, %85 : vector<8x8xf32>
    %87 = arith.truncf %86 : vector<8x8xf32> to vector<8x8xbf16>
    %cst_46 = arith.constant dense<0.000000e+00> : vector<8x16xf32>
    %88 = tpu.matmul %87, %74, %cst_46 {dimension_numbers = #tpu.dot_dimension_numbers<[1], [0], [0], [1], [0, 0, 1, 1], [], []>} : vector<8x8xbf16>, vector<8x16xbf16>, vector<8x16xf32> -> vector<8x16xf32>
    %89 = arith.truncf %88 : vector<8x16xf32> to vector<8x16xbf16>
    %c0_47 = arith.constant 0 : index
    %c32 = arith.constant 32 : index
    %90 = vector.load %arg14[%c0_47, %c32] : memref<8x64xbf16, #tpu.memory_space<vmem>>, vector<8x16xbf16>
    tpu.vector_store %arg14[%c0_47, %c32], %89 {strides = array<i32>} : memref<8x64xbf16, #tpu.memory_space<vmem>>, vector<8x16xbf16>,
    %91 = vector.extract_strided_slice %11 {offsets = [0, 48], sizes = [8, 16], strides = [1, 1]} : vector<8x64xbf16> to vector<8x16xbf16>
    %92 = vector.extract_strided_slice %17 {offsets = [0, 48], sizes = [8, 16], strides = [1, 1]} : vector<8x64xbf16> to vector<8x16xbf16>
    %93 = vector.extract_strided_slice %23 {offsets = [0, 48], sizes = [8, 16], strides = [1, 1]} : vector<8x64xbf16> to vector<8x16xbf16>
    %cst_48 = arith.constant dense<0.000000e+00> : vector<8x8xf32>
    %94 = tpu.matmul %91, %92, %cst_48 {dimension_numbers = #tpu.dot_dimension_numbers<[1], [1], [0], [0], [0, 0, 1, 0], [], []>} : vector<8x16xbf16>, vector<8x16xbf16>, vector<8x8xf32> -> vector<8x8xf32>
    %95 = arith.addf %94, %33 : vector<8x8xf32>
    %cst_49 = arith.constant dense<0xFF800000> : vector<8xf32>
    %96 = vector.multi_reduction <maximumf>, %95, %cst_49 [1] : vector<8x8xf32> to vector<8xf32>
    %97 = vector.shape_cast %96 : vector<8xf32> to vector<8x1xf32>
    %98 = vector.broadcast %97 : vector<8x1xf32> to vector<8x8xf32>
    %99 = arith.subf %95, %98 : vector<8x8xf32>
    %100 = math.exp %99 : vector<8x8xf32>
    %cst_50 = arith.constant dense<0.000000e+00> : vector<8xf32>
    %101 = vector.multi_reduction <add>, %100, %cst_50 [1] : vector<8x8xf32> to vector<8xf32>
    %102 = vector.shape_cast %101 : vector<8xf32> to vector<8x1xf32>
    %103 = tpu.reciprocal %102 {approx = true} : vector<8x1xf32> -> vector<8x1xf32>
    %104 = vector.broadcast %103 : vector<8x1xf32> to vector<8x8xf32>
    %105 = arith.mulf %100, %104 : vector<8x8xf32>
    %106 = arith.truncf %105 : vector<8x8xf32> to vector<8x8xbf16>
    %cst_51 = arith.constant dense<0.000000e+00> : vector<8x16xf32>
    %107 = tpu.matmul %106, %93, %cst_51 {dimension_numbers = #tpu.dot_dimension_numbers<[1], [0], [0], [1], [0, 0, 1, 1], [], []>} : vector<8x8xbf16>, vector<8x16xbf16>, vector<8x16xf32> -> vector<8x16xf32>
    %108 = arith.truncf %107 : vector<8x16xf32> to vector<8x16xbf16>
    %c0_52 = arith.constant 0 : index
    %c48 = arith.constant 48 : index
    %109 = vector.load %arg14[%c0_52, %c48] : memref<8x64xbf16, #tpu.memory_space<vmem>>, vector<8x16xbf16>
    tpu.vector_store %arg14[%c0_52, %c48], %108 {strides = array<i32>} : memref<8x64xbf16, #tpu.memory_space<vmem>>, vector<8x16xbf16>,
    %c0_53 = arith.constant 0 : index
    %c0_54 = arith.constant 0 : index
    %110 = vector.load %arg14[%c0_53, %c0_54] : memref<8x64xbf16, #tpu.memory_space<vmem>>, vector<8x64xbf16>
    %cst_55 = arith.constant dense<0.000000e+00> : vector<8x32xf32>
    %111 = tpu.matmul %110, %24, %cst_55 {dimension_numbers = #tpu.dot_dimension_numbers<[1], [0], [0], [1], [0, 0, 1, 1], [], []>} : vector<8x64xbf16>, vector<64x32xbf16>, vector<8x32xf32> -> vector<8x32xf32>
    %112 = vector.broadcast %25 : vector<1x32xf32> to vector<8x32xf32>
    %113 = arith.addf %111, %112 : vector<8x32xf32>
    %c0_56 = arith.constant 0 : index
    %c0_57 = arith.constant 0 : index
    %c0_58 = arith.constant 0 : index
    %114 = vector.load %arg13[%c0_56, %c0_57, %c0_58] : memref<1x8x32xf32, #tpu.memory_space<vmem>>, vector<1x8x32xf32>
    %115 = vector.shape_cast %114 : vector<1x8x32xf32> to vector<8x32xf32>
    %116 = vector.shape_cast %113 : vector<8x32xf32> to vector<1x8x32xf32>
    tpu.vector_store %arg13[%c0_56, %c0_57, %c0_58], %116 {strides = array<i32>} : memref<1x8x32xf32, #tpu.memory_space<vmem>>, vector<1x8x32xf32>,
    return
  }
  func.func @transform_0(%arg0: i32) -> (i32, i32, i32) {
    %c0_i32 = arith.constant 0 : i32
    %c0_i32_0 = arith.constant 0 : i32
    %c0_i32_1 = arith.constant 0 : i32
    return %arg0, %c0_i32, %c0_i32_0 : i32, i32, i32
  }
  func.func @transform_1(%arg0: i32) -> (i32, i32, i32) {
    %c0_i32 = arith.constant 0 : i32
    %c0_i32_0 = arith.constant 0 : i32
    %c0_i32_1 = arith.constant 0 : i32
    return %arg0, %c0_i32, %c0_i32_0 : i32, i32, i32
  }
  func.func @transform_2(%arg0: i32) -> (i32, i32, i32) {
    %c0_i32 = arith.constant 0 : i32
    %c0_i32_0 = arith.constant 0 : i32
    %c0_i32_1 = arith.constant 0 : i32
    return %arg0, %c0_i32, %c0_i32_0 : i32, i32, i32
  }
  func.func @transform_3(%arg0: i32) -> (i32, i32, i32) {
    %c0_i32 = arith.constant 0 : i32
    %c0_i32_0 = arith.constant 0 : i32
    %c0_i32_1 = arith.constant 0 : i32
    return %arg0, %c0_i32, %c0_i32_0 : i32, i32, i32
  }
  func.func @transform_4(%arg0: i32) -> (i32, i32) {
    %c0_i32 = arith.constant 0 : i32
    %c0_i32_0 = arith.constant 0 : i32
    %c0_i32_1 = arith.constant 0 : i32
    return %c0_i32, %c0_i32_0 : i32, i32
  }
  func.func @transform_5(%arg0: i32) -> (i32, i32) {
    %c0_i32 = arith.constant 0 : i32
    %c0_i32_0 = arith.constant 0 : i32
    %c0_i32_1 = arith.constant 0 : i32
    return %c0_i32, %c0_i32_0 : i32, i32
  }
  func.func @transform_6(%arg0: i32) -> (i32, i32) {
    %c0_i32 = arith.constant 0 : i32
    %c0_i32_0 = arith.constant 0 : i32
    %c0_i32_1 = arith.constant 0 : i32
    return %c0_i32, %c0_i32_0 : i32, i32
  }
  func.func @transform_7(%arg0: i32) -> (i32, i32) {
    %c0_i32 = arith.constant 0 : i32
    %c0_i32_0 = arith.constant 0 : i32
    %c0_i32_1 = arith.constant 0 : i32
    return %c0_i32, %c0_i32_0 : i32, i32
  }
  func.func @transform_8(%arg0: i32) -> (i32, i32) {
    %c0_i32 = arith.constant 0 : i32
    %c0_i32_0 = arith.constant 0 : i32
    %c0_i32_1 = arith.constant 0 : i32
    return %c0_i32, %c0_i32_0 : i32, i32
  }
  func.func @transform_9(%arg0: i32) -> (i32, i32) {
    %c0_i32 = arith.constant 0 : i32
    %c0_i32_0 = arith.constant 0 : i32
    %c0_i32_1 = arith.constant 0 : i32
    return %c0_i32, %c0_i32_0 : i32, i32
  }
  func.func @transform_10(%arg0: i32) -> (i32, i32) {
    %c0_i32 = arith.constant 0 : i32
    %c0_i32_0 = arith.constant 0 : i32
    %c0_i32_1 = arith.constant 0 : i32
    return %c0_i32, %c0_i32_0 : i32, i32
  }
  func.func @transform_11(%arg0: i32) -> (i32, i32) {
    %c0_i32 = arith.constant 0 : i32
    %c0_i32_0 = arith.constant 0 : i32
    %c0_i32_1 = arith.constant 0 : i32
    return %c0_i32, %c0_i32_0 : i32, i32
  }
  func.func @transform_12(%arg0: i32) -> (i32, i32, i32) {
    %c0_i32 = arith.constant 0 : i32
    %c0_i32_0 = arith.constant 0 : i32
    %c0_i32_1 = arith.constant 0 : i32
    return %arg0, %c0_i32, %c0_i32_0 : i32, i32, i32
  }
}

</mosaic_0001>

<bundles_post_ra>
// kernel: tpu_custom_call.1
= control target key start
LH: loop header
LB: loop body
LE: loop exit
PB: predicated region body
PF: predicated region fallthrough
CT: control target
= control target key end

     0   :  { %s1859_s0 = inlined_call_operand.hbm [shape: bf16[2,8,32], index: 0, kind: input, shape index: {}]   ;;  %s1860_s1 = inlined_call_operand.hbm [shape: bf16[2,8,32], index: 1, kind: input, shape index: {}]   ;;  %s1861_s2 = inlined_call_operand.hbm [shape: bf16[2,8,32], index: 2, kind: input, shape index: {}]   ;;  %s1862_s3 = inlined_call_operand.hbm [shape: s8[2,8,8], index: 3, kind: input, shape index: {}]   ;;  %s1863_s4 = inlined_call_operand.vmem [shape: bf16[32,64], index: 4, kind: input, shape index: {}]   ;;  %s1864_s5 = inlined_call_operand.vmem [shape: f32[1,64], index: 5, kind: input, shape index: {}]   ;;  %s1865_s6 = inlined_call_operand.vmem [shape: bf16[32,64], index: 6, kind: input, shape index: {}]   ;;  %s1866_s7 = inlined_call_operand.vmem [shape: f32[1,64], index: 7, kind: input, shape index: {}]   ;;  %s1867_s8 = inlined_call_operand.vmem [shape: bf16[32,64], index: 8, kind: input, shape index: {}]   ;;  %s1868_s9 = inlined_call_operand.vmem [shape: f32[1,64], index: 9, kind: input, shape index: {}]   ;;  %s1869_s10 = inlined_call_operand.vmem [shape: bf16[64,32], index: 10, kind: input, shape index: {}]   ;;  %s1870_s11 = inlined_call_operand.vmem [shape: f32[1,32], index: 11, kind: input, shape index: {}]   ;;  %s1871_s12 = inlined_call_operand.hbm [shape: f32[2,8,32], index: 12, kind: output, shape index: {}]  }
   0x1   :  { %1882 = sst [smem:[#allocation22_spill]] %s1860_s1 }
   0x2   :  { %1883 = sst [smem:[#allocation23_spill]] %s1867_s8 }
   0x3   :  { %1884 = sst [smem:[#allocation24_spill]] %s1868_s9 }
   0x4   :  { %1885 = sst [smem:[#allocation25_spill]] %s1869_s10 }
   0x5   :  { %1886 = sst [smem:[#allocation26_spill]] %s1870_s11 }
   0x6   :  { %1887 = sst [smem:[#allocation27_spill]] %s1871_s12 }
   0x7   :  { %17 = vsyncpa [#allocation4], 0 }
   0x8   :  { %19 = vsyncpa [#allocation4 + $0x1], 0 }
   0x9   :  { %20 = vsyncpa [#allocation7], 0 }
   0xa   :  { %22 = vsyncpa [#allocation7 + $0x1], 0 }
   0xb   :  { %23 = vsyncpa [#allocation10], 0 }
   0xc   :  { %25 = vsyncpa [#allocation10 + $0x1], 0 }
   0xd   :  { %26 = vsyncpa [#allocation5], 0 }
   0xe   :  { %28 = vsyncpa [#allocation5 + $0x1], 0  ;;  %s1566_s21 = smov 0   ;;  %s1568_s22 = smov 0  }
   0xf   :  { %s1570_s23 = smov 0   ;;  %s1572_s24 = smov 0  }
  0x10 LB: > { %1888 = sst [smem:[#allocation16_spill]] %s1480_s21  ;;  %s1587_s25 = sadd.s32 4294967295, %s1492_s24   ;;  %s1492_s24 = sphi %s1572_s24, %s1908_s24   ;;  %s1488_s23 = sphi %s1570_s23, %s1910_s23   ;;  %s1484_s22 = sphi %s1568_s22, %s1912_s22   ;;  %s1480_s21 = sphi %s1566_s21, %s1911_s21  }
  0x11   : > { %1889 = sst [smem:[#allocation17_spill]] %s1488_s23  ;;  %s1127_s26 = sadd.s32 4294967294, %s1492_s24  }
  0x12   : > { %s1591_s27 = sadd.s32 1, %s1492_s24   ;;  %s41_s28 = sadd.s32 1, %s1488_s23 }
  0x13   : > { %1890 = sst [smem:[#allocation18_spill]] %s1591_s27  ;;  %s38_s29 = ssub.s32 %s1492_s24, %s1591_s27 }
  0x14   : > { %p48_p0 = scmp.ne.s32.totalorder %s1488_s23, %s1484_s22  ;;  %p39_p1 = scmp.eq.s32.totalorder %s38_s29, 0 }
  0x15   : > { %p49_p2 = scmp.eq.s32.totalorder %s1492_s24, 0  ;;  %p54_p3 = scmp.ne.s32.totalorder %s1484_s22, %s1480_s21 }
  0x16   : > { %p55_p4 = scmp.eq.s32.totalorder %s1587_s25, 0  ;;  %p324_p7 = scmp.eq.s32.totalorder %s1587_s25, 1 }
  0x17   : > { %s1603_s30 = scalar_select %p39_p1, %s1488_s23, %s41_s28  }
  0x18   : > { %p50_p5 = por %p49_p2, %p48_p0  ;;  %p1605_p6 = por %p55_p4, %p54_p3 }
  0x19   : > { %1891 = sst [smem:[#allocation19_spill]] %s1603_s30  ;;  %p330_p8 = scmp.eq.s32.totalorder %s1127_s26, 1 }
  0x1a   : > { %p1129_p9 = scmp.ge.s32.totalorder %s1492_s24, 2  ;;  %p1237_p10 = scmp.lt.s32.totalorder %s1492_s24, 2 }
  0x1b   : > { %p1612_p11 = por %p324_p7, %p48_p0  ;;  %p1616_p12 = por %p330_p8, %p54_p3 }
  0x1c   : > { %s1621_s16 = sand.u32 1, %s1488_s23   ;;  %s1624_s17 = sshll.u32 %s1492_s24, 2 }
  0x1d   : > { %s1893_s14 = scalar_select %p1612_p11, 1, 0 }
  0x1e   : > { %s1895_s15 = scalar_select %p1616_p12, 1, 0 }
  0x1f   : > { %1894 = sst [smem:[#allocation20_spill]] %s1893_s14  ;;  %s1627_s18 = sshll.u32 %s1621_s16, 2 }
  0x20   : > { %1896 = sst [smem:[#allocation21_spill]] %s1895_s15  ;;  %p1629_p13 = pnand %p1237_p10, %p50_p5 }
  0x21   : > { %s393_s20 = sand.u32 1, %s1492_s24   ;;  %s1898_s1 = sld [smem:[#allocation22_spill]] }
  0x22   : > { %s397_s30 = scalar_lea.vmem [#allocation6], %s1627_s18  ;;  %p1138_p0 = scmp.ge.s32.totalorder %s1492_s24, 1 }
  0x23   : > { %s405_s23 = sshll.u32 %s397_s30, 4  ;;  %s1640_s15 = scalar_lea.sflag [#allocation7], %s393_s20  ;;  %s406_s23 = int_to_ptr.vmem [resolvable:$true] %s405_s23 }
  0x24   : > { %p1302_p2 = pneg %p1629_p13 }
  0x27   : > { %s401_s29 = scalar_lea.hbm %s1898_s1, %s1624_s17  ;;  %s1305_s30 = scalar_lea.hbm %s1898_s1, 8 }
  0x28   : > { %s403_s27 = sshll.u32 %s401_s29, 4  ;;  %s404_s27 = int_to_ptr.hbm [resolvable:$true] %s403_s27 }
  0x29   : > { %s1298_s21 = sshra.s32 %s404_s27, 4  ;;  %s1299_s21 = int_to_ptr.hbm [resolvable:$true] %s1298_s21 }
  0x2a   : > { %s1300_s11 = scalar_lea.hbm %s1299_s21, 4  ;;  %p1306_p5 = scmp.lt.s32.totalorder %s1299_s21, %s1898_s1 }
  0x2b   : > { %p1301_p1 = scmp.ne.s32.totalorder %s1299_s21, %s1300_s11  ;;  %p1307_p7 = scmp.lt.s32.totalorder %s1305_s30, %s1300_s11 }
  0x2d   : > { %p1303_p3 = pnand %p1302_p2, %p1301_p1  ;;  %p1308_p8 = por %p1307_p7, %p1306_p5 }
  0x2f   : > { %p1304_p4 = pneg %p1303_p3 }
  0x31   : > { %p1309_p10 = pnand %p1308_p8, %p1304_p4 }
  0x33   : > { %1312 = shalt.err (!%p1309_p10)
}
  0x34   : > { %1226 = dma.hbm_to_vmem [thread:$0]  (!%p1629_p13), %s404_s27, 64, %s406_s23, %s1640_s15  }
  0x35   : > { %p448_p1 = scmp.lt.s32.totalorder %s1492_s24, 3  ;;  %s382_s14 = scalar_lea.hbm %s1859_s0, %s1624_s17 }
  0x36   : > { %s384_s21 = sshll.u32 %s382_s14, 4  ;;  %s378_s28 = scalar_lea.vmem [#allocation3], %s1627_s18  ;;  %s385_s21 = int_to_ptr.hbm [resolvable:$true] %s384_s21 }
  0x37   : > { %p1663_p3 = pnand %p1138_p0, %p448_p1  ;;  %s386_s30 = sshll.u32 %s378_s28, 4  ;;  %s387_s30 = int_to_ptr.vmem [resolvable:$true] %s386_s30 }
  0x38   : > { %s375_s29 = scalar_lea.sflag [#allocation4], %s1621_s16  ;;  %s1328_s1 = sshra.s32 %s385_s21, 4  ;;  %s1329_s1 = int_to_ptr.hbm [resolvable:$true] %s1328_s1 }
  0x39   : > { %s1330_s12 = scalar_lea.hbm %s1329_s1, 4  ;;  %s1335_s20 = scalar_lea.hbm %s1859_s0, 8 }
  0x3a   : > { %p1331_p4 = scmp.ne.s32.totalorder %s1329_s1, %s1330_s12  ;;  %p1336_p0 = scmp.lt.s32.totalorder %s1329_s1, %s1859_s0 }
  0x3b   : > { %p1337_p8 = scmp.lt.s32.totalorder %s1335_s20, %s1330_s12 }
  0x3c   : > { %p1333_p5 = pnand %p1331_p4, %p1302_p2 }
  0x3d   : > { %p1338_p10 = por %p1337_p8, %p1336_p0 }
  0x3e   : > { %p1334_p7 = pneg %p1333_p5 }
  0x40   : > { %p1339_p1 = pnand %p1338_p10, %p1334_p7 }
  0x42   : > { %1342 = shalt.err (!%p1339_p1)
}
  0x43   : > { %1223 = dma.hbm_to_vmem [thread:$0]  (!%p1629_p13), %s385_s21, 64, %s387_s30, %s375_s29  }
  0x44   : > { %s420_s9 = scalar_lea.hbm %s1861_s2, %s1624_s17  ;;  %s416_s23 = scalar_lea.vmem [#allocation8], %s1627_s18 }
  0x45   : > { %s424_s27 = sshll.u32 %s416_s23, 4  ;;  %s422_s8 = sshll.u32 %s420_s9, 4  ;;  %s425_s27 = int_to_ptr.vmem [resolvable:$true] %s424_s27  ;;  %s423_s8 = int_to_ptr.hbm [resolvable:$true] %s422_s8 }
  0x46   : > { %s1358_s1 = sshra.s32 %s423_s8, 4  ;;  %s1365_s21 = scalar_lea.hbm %s1861_s2, 8  ;;  %s1359_s1 = int_to_ptr.hbm [resolvable:$true] %s1358_s1 }
  0x47   : > { %s1360_s10 = scalar_lea.hbm %s1359_s1, 4  ;;  %p1366_p0 = scmp.lt.s32.totalorder %s1359_s1, %s1861_s2 }
  0x48   : > { %p1361_p4 = scmp.ne.s32.totalorder %s1359_s1, %s1360_s10  ;;  %p1367_p8 = scmp.lt.s32.totalorder %s1365_s21, %s1360_s10 }
  0x4a   : > { %p1363_p5 = pnand %p1361_p4, %p1302_p2  ;;  %p1368_p10 = por %p1367_p8, %p1366_p0 }
  0x4c   : > { %p1364_p7 = pneg %p1363_p5 }
  0x4e   : > { %p1369_p1 = pnand %p1368_p10, %p1364_p7 }
  0x50   : > { %1372 = shalt.err (!%p1369_p1)
}
  0x51   : > { %1229 = dma.hbm_to_vmem [thread:$0]  (!%p1629_p13), %s423_s8, 64, %s425_s27, %s1640_s15  }
  0x52   : > { %s1136_s9 = sshll.u32 %s1621_s16, 1  ;;  %s1137_s17 = sshll.u32 %s1492_s24, 1 }
  0x53   : > { %s439_s14 = scalar_lea.hbm %s1862_s3, %s1137_s17  ;;  %s435_s23 = scalar_lea.vmem [#allocation9], %s1136_s9 }
  0x54   : > { %s441_s28 = sshll.u32 %s439_s14, 4  ;;  %s443_s1 = sshll.u32 %s435_s23, 4  ;;  %s442_s28 = int_to_ptr.hbm [resolvable:$true] %s441_s28  ;;  %s444_s1 = int_to_ptr.vmem [resolvable:$true] %s443_s1 }
  0x55   : > { %s432_s10 = scalar_lea.sflag [#allocation10], %s1621_s16  ;;  %s1388_s12 = sshra.s32 %s442_s28, 4  ;;  %s1389_s12 = int_to_ptr.hbm [resolvable:$true] %s1388_s12 }
  0x56   : > { %s1390_s20 = scalar_lea.hbm %s1389_s12, 2  ;;  %s1395_s27 = scalar_lea.hbm %s1862_s3, 4 }
  0x57   : > { %p1391_p4 = scmp.ne.s32.totalorder %s1389_s12, %s1390_s20  ;;  %p1396_p0 = scmp.lt.s32.totalorder %s1389_s12, %s1862_s3 }
  0x58   : > { %p1397_p8 = scmp.lt.s32.totalorder %s1395_s27, %s1390_s20 }
  0x59   : > { %p1393_p5 = pnand %p1391_p4, %p1302_p2 }
  0x5a   : > { %p1398_p10 = por %p1397_p8, %p1396_p0 }
  0x5b   : > { %p1394_p7 = pneg %p1393_p5 }
  0x5d   : > { %p1399_p1 = pnand %p1398_p10, %p1394_p7 }
  0x5f   : > { %1402 = shalt.err (!%p1399_p1)
}
  0x60   : > { %1232 = dma.hbm_to_vmem [thread:$0]  (!%p1629_p13), %s442_s28, 32, %s444_s1, %s432_s10  }
  0x61   : > { %452 = sbr.rel (%p1663_p3) target bundleno = 1192 (0x4a8), region = 68  ;;  %s1717_s16 = sand.u32 (!%p1663_p3), 1, %s1484_s22  }
  0x62   : > { %s1720_s29 = sshll.u32 (!%p1663_p3), %s1717_s16, 2  ;;  %s455_s9 = scalar_lea.sflag (!%p1663_p3), [#allocation4], %s1717_s16 }
  0x63   : > { %s458_s17 = scalar_lea.vmem (!%p1663_p3), [#allocation3], %s1720_s29 }
  0x66   : > { %1463 = dma.done.wait (%p1605_p6), %s455_s9, 64  }
  0x67   : > { %1465 = vsyncadd (%p1605_p6), %s455_s9, 4294967232  ;;  %s464_s19 = sand.u32 1, %s1587_s25   ;;  %s468_s18 = scalar_lea.vmem [#allocation6], %s1720_s29 }
  0x68   : > { %s465_s11 = scalar_lea.sflag [#allocation7], %s464_s19 }
  0x69   : > { %1467 = dma.done.wait (%p1605_p6), %s465_s11, 128  }
  0x6a   : > { %1469 = vsyncadd (%p1605_p6), %s465_s11, 4294967168  ;;  %s1142_s26 = sshll.u32 %s1717_s16, 1  ;;  %s478_s14 = scalar_lea.vmem [#allocation8], %s1720_s29 }
  0x6b   : > { %s485_s28 = scalar_lea.sflag [#allocation10], %s1717_s16  ;;  %s1737_s23 = scalar_lea.vmem [#allocation9], %s1142_s26 }
  0x6c   : > { %1471 = dma.done.wait (%p1605_p6), %s485_s28, 32  }
  0x6d   : > { %1473 = vsyncadd (%p1605_p6), %s485_s28, 4294967264  ;;  %v1201_v0 = vld [vmem:[%s1863_s4 + $0x8] sm:$0xff]  ;;  %v1200_v2 = vld [vmem:[%s1863_s4] sm:$0xff]  ;;  %vm569_vm0 = vcmask 261120   ;;  %vm675_vm1 = vcmask 130048   ;;  %s1495_s11 = smov 112  }
  0x6e   : > { %v1203_v1 = vld [vmem:[%s1865_s6 + $0x8] sm:$0xff]  ;;  %579 = vmatpush.bf16.msra.mxu0 %v1201_v0  ;;  %v1202_v3 = vld [vmem:[%s1865_s6] sm:$0xff]  ;;  %s1900_s1 = sld [smem:[#allocation23_spill]]  ;;  %v670_v26 = vld [vmem:[%s1737_s23] sm:$0x3]  ;;  %v1497_v33 = vmov 0.0  }
  0x6f   : > { %616 = vmatpush.bf16.msra.mxu1 %v1203_v1  ;;  %v546_v4 = vld [vmem:[%s458_s17] sm:$0xf]  ;;  %v547_v5 = vld [vmem:[%s468_s18] sm:$0xf]  ;;  %v1278_v6 = vld [vmem:[%s1864_s5] ss:$0 sm:$0xff]  ;;  %v671_v30 = vunpack.c.0.s8 %v670_v26 }
  0x70   : > { %v1279_v7 = vld [vmem:[%s1866_s7] ss:$0 sm:$0xff]  ;;  %s1494_s17 = smov 96   ;;  %s1496_s18 = smov 80   ;;  %vm695_vm3 = vcmask 64512   ;;  %vm711_vm4 = vcmask 1043456  }
  0x71   : > { %v672_v32 = vcvt.s32.f32 %v671_v30  ;;  %v548_v41 = vld [vmem:[%s478_s14] sm:$0xf]  ;;  %s1901_s12 = sld [smem:[#allocation24_spill]]  ;;  %vm729_vm5 = vcmask 125952   ;;  %s1498_s20 = smov 16   ;;  %vm801_vm6 = vcmask 257152  }
  0x72   : > { %580 = vmatpush.bf16.msra.mxu0 %v1200_v2  ;;  %s1499_s8 = smov 48   ;;  %s1500_s15 = smov 32   ;;  %vm864_vm7 = vcmask 388352   ;;  %vm927_vm8 = vcmask 519552   ;;  %vm957_vm9 = vcmask 523264  }
  0x73   : > { %617 = vmatpush.bf16.msra.mxu1 %v1202_v3  ;;  %vm673_vm2 = vcmp.eq.f32.partialorder %v672_v32, 0.0  ;;  %s1902_s13 = sld [smem:[#allocation25_spill]]  ;;  %s1197_s26 = sshll.u32 %s1587_s25, 3 }
  0x74   : > { %v1205_v21 = vld [vmem:[%s1900_s1 + $0x8] sm:$0xff]  ;;  %v674_v34 = vsel %vm673_vm2, -2.5e+19, %v1497_v33  ;;  %v1204_v40 = vld [vmem:[%s1900_s1] sm:$0xff]  ;;  %s1143_s28 = sshll.u32 %s1717_s16, 3  ;;  %s1903_s29 = sld [smem:[#allocation27_spill]] }
  0x75   : > { %1152 = vmatmul.msk.bf16.vlgmr.msra.gmra.mxu0 %vm569_vm0, %v546_v4  ;;  %653 = vmatpush.bf16.msra.mxu2 %v1205_v21  ;;  %s544_s27 = scalar_lea.vmem [#allocation11], %s1143_s28  ;;  %s976_s25 = scalar_lea.sflag [#allocation5], %s1717_s16 }
  0x76   : > { %1161 = vmatmul.msk.bf16.vlgmr.msra.gmra.mxu1 %vm569_vm0, %v547_v5  ;;  %s988_s21 = sshll.u32 %s544_s27, 4  ;;  %s989_s21 = int_to_ptr.vmem [resolvable:$true] %s988_s21 }
  0x77   : > { %v1280_v59 = vld [vmem:[%s1901_s12] ss:$0 sm:$0xff] }
  0x79   : > { %654 = vmatpush.bf16.msra.mxu2 %v1204_v40 }
  0x7a   : > { %s986_s12 = scalar_lea.hbm %s1903_s29, %s1197_s26 }
  0x7b   : > { %s990_s30 = sshll.u32 %s986_s12, 4  ;;  %s991_s30 = int_to_ptr.hbm [resolvable:$true] %s990_s30 }
  0x7c   : > { %1170 = vmatmul.msk.bf16.vlgmr.msra.gmra.mxu2 %vm569_vm0, %v548_v41  ;;  %s1432_s9 = sshra.s32 %s991_s30, 4  ;;  %s1433_s9 = int_to_ptr.hbm [resolvable:$true] %s1432_s9 }
  0x7d   : > { %s1434_s19 = scalar_lea.hbm %s1433_s9, 8  ;;  %p1439_p3 = scmp.lt.s32.totalorder %s1433_s9, %s1903_s29 }
  0x7e   : > { %p1435_p6 = scmp.ne.s32.totalorder %s1433_s9, %s1434_s19 }
  0x80   : > { %p1436_p13 = pnand %p1435_p6, %p1612_p11 }
  0x82   : > { %p1437_p2 = pneg %p1436_p13 }
  0xf2   : > { %v582_v8 = vpop.f32.mrf.mxu0 }
  0xf3   : > { %v619_v9 = vpop.f32.mrf.mxu1  ;;  %v583_v10 = vadd.f32 %v1278_v6, %v582_v8 }
  0xf4   : > { %v620_v11 = vadd.f32 %v1279_v7, %v619_v9 }
  0xf5   : > { %v586_v12 = vpack.c.bf16 %v583_v10, %v583_v10 }
  0xf6   : > { %v623_v13 = vpack.c.bf16 %v620_v11, %v620_v11 }
  0xf7   : > { %v732_v14 = vunpack.c.l.b16 %v586_v12 }
  0xf8   : > { %v737_v15 = vunpack.c.l.b16 %v623_v13  ;;  %v680_v16 = vsel %vm675_vm1, %v623_v13, 0 }
  0xf9   : > { %689 = vmatpush.bf16.xpose.msra.mxu3 %v680_v16  ;;  %v733_v17 = vpack.c.b16 %v732_v14, %v732_v14 }
  0xfa   : > { %v738_v18 = vpack.c.b16 %v737_v15, %v737_v15  ;;  %v584_v19 = vpop.f32.mrf.mxu0 }
  0xfb   : > { %v621_v20 = vpop.f32.mrf.mxu1  ;;  %803 = vrot.lane.b32.xlu2 %v733_v17, %s1494_s17 }
  0xfc   : > { %805 = vrot.lane.b32.xlu1 %v738_v18, %s1494_s17  ;;  %739 = vrot.lane.b32.xlu0 %v738_v18, %s1495_s11 }
  0xff   : > { %v656_v60 = vpop.f32.mrf.mxu2 }
 0x100   : > { %1171 = vmatmul.msk.bf16.vlgmr.msra.gmra.mxu3 %vm675_vm1, %v586_v12  ;;  %v657_v61 = vadd.f32 %v1280_v59, %v656_v60 }
 0x102   : > { %v660_v62 = vpack.c.bf16 %v657_v61, %v657_v61 }
 0x103   : > { %866 = vrot.lane.b32.xlu2 %v733_v17, %s1496_s18 }
 0x104   : > { %868 = vrot.lane.b32.xlu1 %v738_v18, %s1496_s18  ;;  %734 = vrot.lane.b32.xlu0 %v733_v17, %s1495_s11  ;;  %v773_v63 = vunpack.c.l.b16 %v660_v62  ;;  %v713_v0 = vsel %vm711_vm4, %v660_v62, 0 }
 0x105   : > { %722 = vmatpush.bf16.msrb.mxu0 %v713_v0 }
 0x106   : > { %v774_v1 = vpack.c.b16 %v773_v63, %v773_v63 }
 0x107   : > { %v658_v2 = vpop.f32.mrf.mxu2 }
 0x155   : > { %v804_v27 = vpop.permute.xlu2 %803 }
 0x15d   : > { %v867_v37 = vpop.permute.xlu2 %866 }
 0x16e   : > { %v806_v22 = vpop.permute.xlu1 %805  ;;  %v740_v23 = vpop.permute.xlu0 %739 }
 0x16f   : > { %v745_v24 = vsel %vm675_vm1, %v740_v23, 0  ;;  %v811_v25 = vsel %vm675_vm1, %v806_v22, 0 }
 0x170   : > { %754 = vmatpush.bf16.xpose.msrb.mxu1 %v745_v24  ;;  %820 = vmatpush.bf16.xpose.msrb.mxu3 %v811_v25 }
 0x176   : > { %v869_v28 = vpop.permute.xlu1 %868  ;;  %v735_v29 = vpop.permute.xlu0 %734 }
 0x177   : > { %v874_v31 = vsel %vm675_vm1, %v869_v28, 0  ;;  %1173 = vmatmul.msk.bf16.vlgmr.msrb.gmra.mxu1 %vm675_vm1, %v735_v29  ;;  %1175 = vmatmul.msk.bf16.vlgmr.msrb.gmra.mxu3 %vm675_vm1, %v804_v27 }
 0x178   : > { %883 = vmatpush.bf16.xpose.msra.mxu1 %v874_v31 }
 0x183   : > { %v691_v35 = vpop.f32.mrf.mxu3 }
 0x184   : > { %v692_v36 = vadd.f32 %v691_v35, %v674_v34 }
 0x186   : > { %v696_v38 = vsel %vm695_vm3, %v692_v36, -inf }
 0x187   : > { %1177 = vmatmul.msk.bf16.vlgmr.msra.gmra.mxu1 %vm675_vm1, %v867_v37  ;;  %697 = vmax.xlane.f32.xlu1 %v696_v38 }
 0x18b   : > { %v693_v39 = vpop.f32.mrf.mxu3 }
 0x1f4   : > { %v756_v42 = vpop.f32.mrf.mxu1 }
 0x1f5   : > { %v757_v43 = vadd.f32 %v756_v42, %v674_v34 }
 0x1f7   : > { %v760_v44 = vsel %vm695_vm3, %v757_v43, -inf }
 0x1f8   : > { %761 = vmax.xlane.f32.xlu0 %v760_v44 }
 0x1fa   : > { %v822_v45 = vpop.f32.mrf.mxu3  ;;  %v698_v46 = vpop.xlane.xlu1 %697 }
 0x1fb   : > { %v699_v47 = vsub.f32 %v692_v36, %v698_v46  ;;  %v823_v56 = vadd.f32 %v822_v45, %v674_v34 }
 0x1fc   : > { %v758_v48 = vpop.f32.mrf.mxu1 }
 0x1fd   : > { %v700_v49 = vmul.f32 1.442695, %v699_v47  ;;  %v826_v58 = vsel %vm695_vm3, %v823_v56, -inf }
 0x1ff   : > { %1282 = vpow2.f32 %v700_v49 }
 0x202   : > { %v824_v50 = vpop.f32.mrf.mxu3 }
 0x204   : > { %v885_v51 = vpop.f32.mrf.mxu1 }
 0x205   : > { %v1283_v52 = vpop.eup %1282  ;;  %v886_v53 = vadd.f32 %v885_v51, %v674_v34 }
 0x206   : > { %v702_v54 = vsel %vm695_vm3, %v1283_v52, 0.0 }
 0x207   : > { %703 = vadd.xlane.f32.xlu1 %v702_v54  ;;  %v889_v55 = vsel %vm695_vm3, %v886_v53, -inf }
 0x208   : > { %890 = vmax.xlane.f32.xlu2 %v889_v55  ;;  %v1207_v55 = vld [vmem:[%s1902_s13 + $0x8] sm:$0xff] }
 0x20c   : > { %v887_v57 = vpop.f32.mrf.mxu1 }
 0x210   : > { %827 = vmax.xlane.f32.xlu2 %v826_v58 }
 0x228   : > { %775 = vrot.lane.b32.xlu2 %v774_v1, %s1495_s11 }
 0x26b   : > { %v762_v3 = vpop.xlane.xlu0 %761 }
 0x26c   : > { %v763_v4 = vsub.f32 %v757_v43, %v762_v3 }
 0x26e   : > { %v764_v5 = vmul.f32 1.442695, %v763_v4 }
 0x270   : > { %1284 = vpow2.f32 %v764_v5 }
 0x276   : > { %v1285_v6 = vpop.eup %1284 }
 0x277   : > { %v766_v7 = vsel %vm695_vm3, %v1285_v6, 0.0 }
 0x278   : > { %767 = vadd.xlane.f32.xlu0 %v766_v7 }
 0x27a   : > { %v704_v8 = vpop.xlane.xlu1 %703 }
 0x27b   : > { %1286 = vrcp.f32 %v704_v8  ;;  %v891_v9 = vpop.xlane.xlu2 %890 }
 0x27c   : > { %v892_v10 = vsub.f32 %v886_v53, %v891_v9  ;;  %v1208_v53 = vld [vmem:[%s1902_s13 + $0x10] sm:$0xff] }
 0x27e   : > { %v893_v11 = vmul.f32 1.442695, %v892_v10 }
 0x280   : > { %1288 = vpow2.f32 %v893_v11 }
 0x281   : > { %v1287_v12 = vpop.eup %1286 }
 0x282   : > { %v706_v13 = vmul.f32 %v1287_v12, %v1283_v52  ;;  %v1209_v52 = vld [vmem:[%s1902_s13 + $0x18] sm:$0xff] }
 0x283   : > { %v828_v14 = vpop.xlane.xlu2 %827  ;;  %965 = vmatpush.bf16.msra.mxu3 %v1209_v52 }
 0x284   : > { %v829_v15 = vsub.f32 %v823_v56, %v828_v14  ;;  %v707_v16 = vpack.c.bf16 %v706_v13, %v706_v13  ;;  %v1206_v56 = vld [vmem:[%s1902_s13] sm:$0xff] }
 0x286   : > { %v1289_v17 = vpop.eup %1288  ;;  %v830_v18 = vmul.f32 1.442695, %v829_v15  ;;  %1172 = vmatmul.msk.bf16.vlgmr.msrb.gmra.mxu0 %vm695_vm3, %v707_v16 }
 0x287   : > { %v895_v19 = vsel %vm695_vm3, %v1289_v17, 0.0  ;;  %966 = vmatpush.bf16.msra.mxu3 %v1208_v53 }
 0x288   : > { %1290 = vpow2.f32 %v830_v18  ;;  %896 = vadd.xlane.f32.xlu0 %v895_v19 }
 0x28b   : > { %v776_v22 = vpop.permute.xlu2 %775  ;;  %967 = vmatpush.bf16.msra.mxu3 %v1207_v55 }
 0x28c   : > { %v781_v23 = vsel %vm711_vm4, %v776_v22, 0 }
 0x28d   : > { %790 = vmatpush.bf16.msrb.mxu2 %v781_v23 }
 0x28e   : > { %v1291_v20 = vpop.eup %1290 }
 0x28f   : > { %v832_v21 = vsel %vm695_vm3, %v1291_v20, 0.0  ;;  %968 = vmatpush.bf16.msra.mxu3 %v1206_v56 }
 0x290   : > { %833 = vadd.xlane.f32.xlu1 %v832_v21 }
 0x29c   : > { %901 = vrot.lane.b32.xlu0 %v774_v1, %s1496_s18  ;;  %s1438_s18 = scalar_lea.hbm %s1903_s29, 16 }
 0x29d   : > { %p1440_p4 = scmp.lt.s32.totalorder %s1438_s18, %s1434_s19 }
 0x29f   : > { %p1441_p5 = por %p1440_p4, %p1439_p3 }
 0x2a1   : > { %p1442_p7 = pnand %p1441_p5, %p1437_p2 }
 0x2a9   : > { %838 = vrot.lane.b32.xlu1 %v774_v1, %s1494_s17 }
 0x2eb   : > { %v768_v24 = vpop.xlane.xlu0 %767 }
 0x2ec   : > { %1292 = vrcp.f32 %v768_v24 }
 0x2f2   : > { %v1293_v25 = vpop.eup %1292 }
 0x2f3   : > { %v770_v26 = vmul.f32 %v1293_v25, %v1285_v6 }
 0x2f5   : > { %v771_v27 = vpack.c.bf16 %v770_v26, %v770_v26 }
 0x2f7   : > { %1174 = vmatmul.msk.bf16.vlgmr.msrb.gmra.mxu2 %vm695_vm3, %v771_v27 }
 0x2fb   : > { %v897_v28 = vpop.xlane.xlu0 %896 }
 0x2fc   : > { %1294 = vrcp.f32 %v897_v28 }
 0x302   : > { %v1295_v31 = vpop.eup %1294 }
 0x303   : > { %v724_v29 = vpop.f32.mrf.mxu0  ;;  %v899_v33 = vmul.f32 %v1295_v31, %v1289_v17  ;;  %v834_v34 = vpop.xlane.xlu1 %833 }
 0x304   : > { %v728_v30 = vpack.c.bf16 %v724_v29, %v724_v29  ;;  %1296 = vrcp.f32 %v834_v34 }
 0x305   : > { %v900_v37 = vpack.c.bf16 %v899_v33, %v899_v33 }
 0x306   : > { %730 = vst.msk [vmem:[#allocation2] sm:$0xf] %vm729_vm5, %v728_v30 }
 0x30a   : > { %v1297_v38 = vpop.eup %1296 }
 0x30b   : > { %v726_v32 = vpop.f32.mrf.mxu0  ;;  %v836_v39 = vmul.f32 %v1297_v38, %v1291_v20 }
 0x30d   : > { %v837_v42 = vpack.c.bf16 %v836_v39, %v836_v39 }
 0x30e   : > { %v902_v35 = vpop.permute.xlu0 %901 }
 0x30f   : > { %v907_v36 = vsel %vm711_vm4, %v902_v35, 0 }
 0x310   : > { %916 = vmatpush.bf16.msra.mxu2 %v907_v36 }
 0x313   : > { %1178 = vmatmul.msk.bf16.vlgmr.msra.gmra.mxu2 %vm695_vm3, %v900_v37 }
 0x31b   : > { %v839_v40 = vpop.permute.xlu1 %838 }
 0x31c   : > { %v844_v41 = vsel %vm711_vm4, %v839_v40, 0 }
 0x31d   : > { %853 = vmatpush.bf16.msra.mxu0 %v844_v41 }
 0x320   : > { %1176 = vmatmul.msk.bf16.vlgmr.msra.gmra.mxu0 %vm695_vm3, %v837_v42 }
 0x37a   : > { %v792_v43 = vpop.f32.mrf.mxu2 }
 0x37b   : > { %v796_v44 = vpack.c.bf16 %v792_v43, %v792_v43 }
 0x37d   : > { %798 = vrot.lane.b32.xlu2 %v796_v44, %s1498_s20 }
 0x382   : > { %v794_v45 = vpop.f32.mrf.mxu2 }
 0x396   : > { %v918_v46 = vpop.f32.mrf.mxu2 }
 0x397   : > { %v922_v47 = vpack.c.bf16 %v918_v46, %v918_v46 }
 0x399   : > { %924 = vrot.lane.b32.xlu2 %v922_v47, %s1499_s8 }
 0x39d   : > { %v855_v48 = vpop.f32.mrf.mxu0 }
 0x39e   : > { %v859_v49 = vpack.c.bf16 %v855_v48, %v855_v48  ;;  %v920_v50 = vpop.f32.mrf.mxu2 }
 0x3a0   : > { %861 = vrot.lane.b32.xlu0 %v859_v49, %s1500_s15  ;;  %s1905_s15 = sld [smem:[#allocation26_spill]] }
 0x3a5   : > { %v857_v51 = vpop.f32.mrf.mxu0 }
 0x3a6   : > { %v1281_v60 = vld [vmem:[%s1905_s15] ss:$0 sm:$0xff] }
 0x3d7   : > { %v799_v54 = vpop.permute.xlu2 %798 }
 0x3d8   : > { %802 = vst.msk [vmem:[#allocation2] sm:$0xf] %vm801_vm6, %v799_v54 }
 0x3f3   : > { %v925_v58 = vpop.permute.xlu2 %924 }
 0x412   : > { %v862_v57 = vpop.permute.xlu0 %861 }
 0x413   : > { %865 = vst.msk [vmem:[#allocation2] sm:$0xf] %vm864_vm7, %v862_v57 }
 0x414   : > { %928 = vst.msk [vmem:[#allocation2] sm:$0xf] %vm927_vm8, %v925_v58 }
 0x41b   : > { %v929_v59 = vld [vmem:[#allocation2] sm:$0xf] }
 0x41c   : > { %1195 = vmatmul.msk.bf16.vlgmr.msra.gmra.mxu3 %vm957_vm9, %v929_v59 }
 0x49f   : > { %v970_v61 = vpop.f32.mrf.mxu3 }
 0x4a0   : > { %v971_v62 = vadd.f32 %v1281_v60, %v970_v61 }
 0x4a2   : > { %974 = vst.msk [vmem:[%s544_s27] sm:$0xff] %vm569_vm0, %v971_v62 }
 0x4a3   : > { %1445 = shalt.err (!%p1442_p7)
}
 0x4a4   : > { %1218 = dma.vmem_to_hbm [thread:$0]  (%p1612_p11), %s989_s21, 128, %s991_s30, %s976_s25  }
 0x4a7   : > { %v972_v63 = vpop.f32.mrf.mxu3 }
 0x4a8 PF: > { %s1906_s16 = sld [smem:[#allocation16_spill]]  ;;  %p1234_p0 = pnand %p1129_p9, %p1616_p12 }
 0x4aa   : > { %p1235_p8 = pneg %p1234_p0 }
 0x4ae   : > { %s1002_s10 = sand.u32 1, %s1906_s16  }
 0x4af   : > { %s1003_s12 = scalar_lea.sflag [#allocation5], %s1002_s10 }
 0x4b0   : > { %1475 = dma.done.wait (%p1235_p8), %s1003_s12, 128  }
 0x4b1   : > { %1477 = vsyncadd (%p1235_p8), %s1003_s12, 4294967168  ;;  %s1908_s24 = sld [smem:[#allocation18_spill]]  ;;  %s1911_s21 = smov %s1484_s22 }
 0x4b2   : > { %s1909_s20 = sld [smem:[#allocation17_spill]] }
 0x4b3   : > { %s1910_s23 = sld [smem:[#allocation19_spill]] }
 0x4b7   : > { %p31_p10 = scmp.ge.s32.totalorder %s1908_s24, 4  }
 0x4b8   : > { %s1912_s22 = smov %s1909_s20 }
 0x4b9   :  { %33 = sbr.rel (!%p31_p10) target bundleno = 16 (0x10), region = 150 }
 0x4be   :  { %1009 = vsyncpa [#allocation4], 1 }
 0x4bf   :  { %1011 = vsyncpa [#allocation4 + $0x1], 1 }
 0x4c0   :  { %1012 = vsyncpa [#allocation7], 1 }
 0x4c1   :  { %1014 = vsyncpa [#allocation7 + $0x1], 1 }
 0x4c2   :  { %1015 = vsyncpa [#allocation10], 1 }
 0x4c3   :  { %1017 = vsyncpa [#allocation10 + $0x1], 1 }
 0x4c4   :  { %1018 = vsyncpa [#allocation5], 1 }
 0x4c5   :  { %1020 = vsyncpa [#allocation5 + $0x1], 1 }

</bundles_post_ra>
